<compile_context>
chip_gen: v7x
topology: tpu7x:2x2x1
jax: 0.10.0
libtpu: 0.0.40
codegen_flags: <defaults>
</compile_context>

<pallas_src>
import functools

import jax
import jax.numpy as jnp
from jax import lax
from jax.experimental import pallas as pl
from jax.experimental.pallas import tpu as pltpu


# ---------------------------------------------------------------------------
# Fused Pallas kernel: block-diagonal conv-GEMM + BatchNorm (batch stats, single-pass)
#                      + ReLU + 2x2 max-pool, both branches in one MXU pass.
# ---------------------------------------------------------------------------
def fused_grouped_kernel(p_ref, w_ref, gb_ref, o_ref, *, r, eps):
    # p_ref:  (2*Kp, 4*r)    stacked im2col patches [branch1 ; branch2], M ordered
    #                        (ph, pw, n, d, hp, wp) so pool windows are lane blocks
    # w_ref:  (2*Cout, 2*Kp) block-diagonal conv weights (K zero-padded per branch)
    # gb_ref: (2*Cout, 2)    column 0 = gamma, column 1 = beta  (f32)
    # o_ref:  (2*Cout, r)    pooled output (channels on sublanes, positions on lanes)
    y = jnp.dot(w_ref[...], p_ref[...],
                preferred_element_type=jnp.float32)          # (2*Cout, 4r) f32, lane-dense

    # BatchNorm3d batch statistics (biased variance), one sweep: E[y] and E[y^2].
    inv_m = 1.0 / y.shape[1]
    mean = jnp.sum(y, axis=1, keepdims=True) * inv_m          # (2*Cout, 1)
    ex2 = jnp.sum(y * y, axis=1, keepdims=True) * inv_m
    var = ex2 - mean * mean

    gb = gb_ref[...]
    scale = gb[:, 0:1] * lax.rsqrt(var + eps)                 # rsqrt -> EUP slot
    shift = gb[:, 1:2] - mean * scale

    z = jnp.maximum(y * scale + shift, 0.0)                   # BN affine + ReLU

    # MaxPool3d((1,2,2)): the 4 pool-window elements are 4 contiguous lane blocks
    # of width r (r is a multiple of 128 here -> exact vreg lane-block slices).
    o_ref[...] = jnp.maximum(jnp.maximum(z[:, 0 * r:1 * r], z[:, 1 * r:2 * r]),
                             jnp.maximum(z[:, 2 * r:3 * r], z[:, 3 * r:4 * r]))


# ---------------------------------------------------------------------------
# XLA glue: im2col (transposed, pool-friendly M ordering) + block-diagonal weights
# ---------------------------------------------------------------------------
def _im2col_transposed(x, k, s):
    """x: [N, Cin, D, H, W] -> patches_t [Kp, M] with
       K = (kd, kh, kw, cin) and M = (ph, pw, n, do, hp, wp) flattened."""
    x_cl = jnp.transpose(x, (0, 2, 3, 4, 1))                  # channels-last
    N, D, H, W, Cin = x_cl.shape
    Do = (D - k) // s + 1
    Ho = (H - k) // s + 1
    Wo = (W - k) // s + 1
    Hp, Wp = Ho // 2, Wo // 2
    # TODO(synk): odd Ho/Wo needs the cropped rows/cols kept for BN statistics; only even
    #             pooled extents are supported by this fully fused path.
    assert Ho == 2 * Hp and Wo == 2 * Wp, "fused path requires even conv-output H/W"

    cols = []
    for kd in range(k):
        for kh in range(k):
            for kw in range(k):
                sl = x_cl[:, kd:kd + (Do - 1) * s + 1:s,
                          kh:kh + (Ho - 1) * s + 1:s,
                          kw:kw + (Wo - 1) * s + 1:s, :]       # [N, Do, Ho, Wo, Cin]
                cols.append(sl)
    p = jnp.stack(cols, axis=0)                                # [k^3, N, Do, Ho, Wo, Cin]
    p = p.reshape(k ** 3, N, Do, Hp, 2, Wp, 2, Cin)
    #             0      1  2   3   4  5   6  7
    p = jnp.transpose(p, (0, 7, 4, 6, 1, 2, 3, 5))             # [k^3, Cin, ph, pw, N, Do, Hp, Wp]
    K = k ** 3 * Cin
    M = 4 * N * Do * Hp * Wp
    p = p.reshape(K, M)

    Kp = ((K + 127) // 128) * 128                              # pad K to a lane multiple
    if Kp != K:
        p = jnp.pad(p, ((0, Kp - K), (0, 0)))
    return p, (N, Do, Hp, Wp, Kp)


def _block_diag_weights(w1, w2, Kp):
    """torch layout [Cout, Cin, kd, kh, kw] x2 -> blockdiag matrix (2*Cout, 2*Kp)."""
    Cout = w1.shape[0]

    def flat(w):
        wt = jnp.transpose(w, (0, 2, 3, 4, 1)).reshape(Cout, -1)   # K = (kd, kh, kw, cin)
        K = wt.shape[1]
        if Kp != K:
            wt = jnp.pad(wt, ((0, 0), (0, Kp - K)))
        return wt

    wt1, wt2 = flat(w1), flat(w2)
    top = jnp.concatenate([wt1, jnp.zeros_like(wt2)], axis=1)       # (Cout, 2*Kp)
    bot = jnp.concatenate([jnp.zeros_like(wt1), wt2], axis=1)
    return jnp.concatenate([top, bot], axis=0)                      # (2*Cout, 2*Kp)


# ---------------------------------------------------------------------------
# Public API: both branches in one single-step pallas_call
# ---------------------------------------------------------------------------
@functools.partial(jax.jit, static_argnums=(4, 5, 6))
def _grouped_conv3d_impl(x1, x2, params1, params2, kernel_size, stride, compute_dtype):
    w1, _b1, g1, be1 = params1    # conv bias unused: cancels exactly under batch-stat BN
    w2, _b2, g2, be2 = params2
    Cout = w1.shape[0]

    # TODO(synk): production shapes should build these patches on-chip (manual DMA of the
    #             halo window) instead of materializing the amplified patch tensor in HBM.
    p1, (N, Do, Hp, Wp, Kp) = _im2col_transposed(x1, kernel_size, stride)
    p2, _ = _im2col_transposed(x2, kernel_size, stride)

    R = N * Do * Hp * Wp          # pooled positions per branch (multiple of 128 here)
    M = 4 * R                     # conv-output positions per branch

    patches = jnp.concatenate([p1, p2], axis=0).astype(compute_dtype)   # (2*Kp, M)
    w_bd = _block_diag_weights(w1, w2, Kp).astype(compute_dtype)        # (2*Cout, 2*Kp)
    gb = jnp.stack([jnp.concatenate([g1, g2]),
                    jnp.concatenate([be1, be2])], axis=1).astype(jnp.float32)  # (2*Cout, 2)

    out = pl.pallas_call(
        functools.partial(fused_grouped_kernel, r=R, eps=1e-5),
        out_shape=jax.ShapeDtypeStruct((2 * Cout, R), jnp.float32),
        grid_spec=pltpu.PrefetchScalarGridSpec(
            num_scalar_prefetch=0,
            grid=(1,),                                      # single fused step
            in_specs=[
                pl.BlockSpec((2 * Kp, M), lambda i: (0, 0)),
                pl.BlockSpec((2 * Cout, 2 * Kp), lambda i: (0, 0)),
                pl.BlockSpec((2 * Cout, 2), lambda i: (0, 0)),
            ],
            out_specs=pl.BlockSpec((2 * Cout, R), lambda i: (0, 0)),
        ),
        compiler_params=pltpu.CompilerParams(
            dimension_semantics=("arbitrary",),
            # ~1 MiB of VMEM per step double-buffered; default scoped limits
            # (16/32/32 MiB on v5e/v6e/v7x) are more than enough.
        ),
    )(patches, w_bd, gb)

    # (2*Cout, R) -> two NCDHW tensors [N, Cout, Do, Hp, Wp]
    out = out.reshape(2, Cout, N, Do, Hp, Wp)
    # TODO(synk): at production scale let the consumer take the kernel-native layout
    #             instead of paying this extra HBM transpose pass.
    out = jnp.transpose(out, (0, 2, 1, 3, 4, 5))
    return out[0], out[1]


def grouped_conv3d(x1, x2, params1, params2, kernel_size, stride,
                   compute_dtype=jnp.float32):
    """Forward pass of GroupedConv3d. Inputs/outputs use PyTorch NCDHW layout.

    compute_dtype=jnp.bfloat16 halves the patch/weight HBM + VMEM traffic (MXU still
    accumulates in f32); it slightly perturbs the conv numerics vs. the f32 reference.
    """
    return _grouped_conv3d_impl(x1, x2, params1, params2, kernel_size, stride,
                                compute_dtype)


def init_branch_params(key, in_channels, out_channels, kernel_size):
    k1, k2, k3, k4 = jax.random.split(key, 4)
    fan_in = in_channels * kernel_size ** 3
    bound = 1.0 / (fan_in ** 0.5)
    w = jax.random.uniform(
        k1, (out_channels, in_channels, kernel_size, kernel_size, kernel_size),
        jnp.float32, -bound, bound)
    b = jax.random.uniform(k2, (out_channels,), jnp.float32, -bound, bound)
    gamma = 1.0 + 0.1 * jax.random.normal(k3, (out_channels,), jnp.float32)
    beta = 0.1 * jax.random.normal(k4, (out_channels,), jnp.float32)
    return w, b, gamma, beta


# ---------------------------------------------------------------------------
# Pure-JAX reference (for verification only; includes the conv bias)
# ---------------------------------------------------------------------------
def reference_branch(x, params, k, s, eps=1e-5):
    w, b, gamma, beta = params
    y = lax.conv_general_dilated(
        x, w, (s, s, s), "VALID",
        dimension_numbers=("NCDHW", "OIDHW", "NCDHW")) + b.reshape(1, -1, 1, 1, 1)
    mean = jnp.mean(y, axis=(0, 2, 3, 4), keepdims=True)
    var = jnp.mean(jnp.square(y - mean), axis=(0, 2, 3, 4), keepdims=True)
    y = (y - mean) * lax.rsqrt(var + eps) * gamma.reshape(1, -1, 1, 1, 1) \
        + beta.reshape(1, -1, 1, 1, 1)
    y = jnp.maximum(y, 0.0)
    N, C, D, H, W = y.shape
    Hp, Wp = H // 2, W // 2
    return y[:, :, :, :Hp * 2, :Wp * 2].reshape(N, C, D, Hp, 2, Wp, 2).max(axis=(4, 6))


if __name__ == "__main__":
    # GroupedConv3d(in_channels=4, out_channels=8, kernel_size=3, stride=1)
    in_channels, out_channels, kernel_size, stride = 4, 8, 3, 1
    N, D, H, W = 2, 10, 10, 10

    root = jax.random.PRNGKey(0)
    kx1, kx2, kp1, kp2 = jax.random.split(root, 4)
    x1 = jax.random.normal(kx1, (N, in_channels, D, H, W), jnp.float32)
    x2 = jax.random.normal(kx2, (N, in_channels, D, H, W), jnp.float32)
    params1 = init_branch_params(kp1, in_channels, out_channels, kernel_size)
    params2 = init_branch_params(kp2, in_channels, out_channels, kernel_size)

    # f32 path (matches PyTorch float32 forward numerics)
    y1, y2 = grouped_conv3d(x1, x2, params1, params2, kernel_size, stride)
    jax.block_until_ready((y1, y2))

    r1 = reference_branch(x1, params1, kernel_size, stride)
    r2 = reference_branch(x2, params2, kernel_size, stride)
    assert y1.shape == r1.shape and y2.shape == r2.shape
    assert jnp.allclose(y1, r1, rtol=1e-4, atol=1e-4)
    assert jnp.allclose(y2, r2, rtol=1e-4, atol=1e-4)

    # bf16 patch/weight streaming path (perf option): looser tolerance vs f32 reference
    z1, z2 = grouped_conv3d(x1, x2, params1, params2, kernel_size, stride,
                            compute_dtype=jnp.bfloat16)
    jax.block_until_ready((z1, z2))
    assert jnp.allclose(z1, r1, rtol=5e-2, atol=5e-2)
    assert jnp.allclose(z2, r2, rtol=5e-2, atol=5e-2)

    print("KERNEL_OK")
</pallas_src>

<mosaic_0001>
module attributes {stable_mosaic.version = 11 : i64} {
  func.func @fused_grouped_kernel(%arg0: i32, %arg1: memref<256x1024xf32, #tpu.memory_space<vmem>>, %arg2: memref<16x256xf32, #tpu.memory_space<vmem>>, %arg3: memref<16x2xf32, #tpu.memory_space<vmem>>, %arg4: memref<16x256xf32, #tpu.memory_space<vmem>>) attributes {dimension_semantics = [#tpu.dimension_semantics<arbitrary>], iteration_bounds = array<i64: 1>, scalar_prefetch = 0 : i64, scratch_operands = 0 : i64, tpu.core_type = #tpu.core_type<tc>, window_params = [{pipeline_mode = #tpu.pipeline_mode<synchronous>, transform_indices = @transform_0, window_bounds = array<i64: 256, 1024>}, {pipeline_mode = #tpu.pipeline_mode<synchronous>, transform_indices = @transform_1, window_bounds = array<i64: 16, 256>}, {pipeline_mode = #tpu.pipeline_mode<synchronous>, transform_indices = @transform_2, window_bounds = array<i64: 16, 2>}, {pipeline_mode = #tpu.pipeline_mode<synchronous>, transform_indices = @transform_3, window_bounds = array<i64: 16, 256>}]} {
    %c0 = arith.constant 0 : index
    %c0_0 = arith.constant 0 : index
    %0 = vector.load %arg2[%c0, %c0_0] : memref<16x256xf32, #tpu.memory_space<vmem>>, vector<16x256xf32>
    %c0_1 = arith.constant 0 : index
    %c0_2 = arith.constant 0 : index
    %1 = vector.load %arg1[%c0_1, %c0_2] : memref<256x1024xf32, #tpu.memory_space<vmem>>, vector<256x1024xf32>
    %cst = arith.constant dense<0.000000e+00> : vector<16x1024xf32>
    %2 = tpu.matmul %0, %1, %cst {dimension_numbers = #tpu.dot_dimension_numbers<[1], [0], [0], [1], [0, 0, 1, 1], [], []>} : vector<16x256xf32>, vector<256x1024xf32>, vector<16x1024xf32> -> vector<16x1024xf32>
    %cst_3 = arith.constant dense<0.000000e+00> : vector<16xf32>
    %3 = vector.multi_reduction <add>, %2, %cst_3 [1] : vector<16x1024xf32> to vector<16xf32>
    %4 = vector.shape_cast %3 : vector<16xf32> to vector<16x1xf32>
    %cst_4 = arith.constant 9.765625E-4 : f32
    %5 = vector.broadcast %cst_4 : f32 to vector<16x1xf32>
    %6 = arith.mulf %4, %5 : vector<16x1xf32>
    %7 = arith.mulf %2, %2 : vector<16x1024xf32>
    %cst_5 = arith.constant dense<0.000000e+00> : vector<16xf32>
    %8 = vector.multi_reduction <add>, %7, %cst_5 [1] : vector<16x1024xf32> to vector<16xf32>
    %9 = vector.shape_cast %8 : vector<16xf32> to vector<16x1xf32>
    %cst_6 = arith.constant 9.765625E-4 : f32
    %10 = vector.broadcast %cst_6 : f32 to vector<16x1xf32>
    %11 = arith.mulf %9, %10 : vector<16x1xf32>
    %12 = arith.mulf %6, %6 : vector<16x1xf32>
    %13 = arith.subf %11, %12 : vector<16x1xf32>
    %c0_7 = arith.constant 0 : index
    %c0_8 = arith.constant 0 : index
    %14 = vector.load %arg3[%c0_7, %c0_8] : memref<16x2xf32, #tpu.memory_space<vmem>>, vector<16x2xf32>
    %15 = vector.extract_strided_slice %14 {offsets = [0, 0], sizes = [16, 1], strides = [1, 1]} : vector<16x2xf32> to vector<16x1xf32>
    %cst_9 = arith.constant 9.99999974E-6 : f32
    %16 = vector.broadcast %cst_9 : f32 to vector<16x1xf32>
    %17 = arith.addf %13, %16 : vector<16x1xf32>
    %18 = math.rsqrt %17 : vector<16x1xf32>
    %19 = arith.mulf %15, %18 : vector<16x1xf32>
    %20 = vector.extract_strided_slice %14 {offsets = [0, 1], sizes = [16, 1], strides = [1, 1]} : vector<16x2xf32> to vector<16x1xf32>
    %21 = arith.mulf %6, %19 : vector<16x1xf32>
    %22 = arith.subf %20, %21 : vector<16x1xf32>
    %23 = vector.broadcast %19 : vector<16x1xf32> to vector<16x1024xf32>
    %24 = arith.mulf %2, %23 : vector<16x1024xf32>
    %25 = vector.broadcast %22 : vector<16x1xf32> to vector<16x1024xf32>
    %26 = arith.addf %24, %25 : vector<16x1024xf32>
    %cst_10 = arith.constant 0.000000e+00 : f32
    %27 = vector.broadcast %cst_10 : f32 to vector<16x1024xf32>
    %28 = arith.maximumf %26, %27 : vector<16x1024xf32>
    %29 = vector.extract_strided_slice %28 {offsets = [0, 0], sizes = [16, 256], strides = [1, 1]} : vector<16x1024xf32> to vector<16x256xf32>
    %30 = vector.extract_strided_slice %28 {offsets = [0, 256], sizes = [16, 256], strides = [1, 1]} : vector<16x1024xf32> to vector<16x256xf32>
    %31 = arith.maximumf %29, %30 : vector<16x256xf32>
    %32 = vector.extract_strided_slice %28 {offsets = [0, 512], sizes = [16, 256], strides = [1, 1]} : vector<16x1024xf32> to vector<16x256xf32>
    %33 = vector.extract_strided_slice %28 {offsets = [0, 768], sizes = [16, 256], strides = [1, 1]} : vector<16x1024xf32> to vector<16x256xf32>
    %34 = arith.maximumf %32, %33 : vector<16x256xf32>
    %35 = arith.maximumf %31, %34 : vector<16x256xf32>
    %c0_11 = arith.constant 0 : index
    %c0_12 = arith.constant 0 : index
    %36 = vector.load %arg4[%c0_11, %c0_12] : memref<16x256xf32, #tpu.memory_space<vmem>>, vector<16x256xf32>
    tpu.vector_store %arg4[%c0_11, %c0_12], %35 {strides = array<i32>} : memref<16x256xf32, #tpu.memory_space<vmem>>, vector<16x256xf32>,
    return
  }
  func.func @transform_0(%arg0: i32) -> (i32, i32) {
    %c0_i32 = arith.constant 0 : i32
    %c0_i32_0 = arith.constant 0 : i32
    %c0_i32_1 = arith.constant 0 : i32
    return %c0_i32, %c0_i32_0 : i32, i32
  }
  func.func @transform_1(%arg0: i32) -> (i32, i32) {
    %c0_i32 = arith.constant 0 : i32
    %c0_i32_0 = arith.constant 0 : i32
    %c0_i32_1 = arith.constant 0 : i32
    return %c0_i32, %c0_i32_0 : i32, i32
  }
  func.func @transform_2(%arg0: i32) -> (i32, i32) {
    %c0_i32 = arith.constant 0 : i32
    %c0_i32_0 = arith.constant 0 : i32
    %c0_i32_1 = arith.constant 0 : i32
    return %c0_i32, %c0_i32_0 : i32, i32
  }
  func.func @transform_3(%arg0: i32) -> (i32, i32) {
    %c0_i32 = arith.constant 0 : i32
    %c0_i32_0 = arith.constant 0 : i32
    %c0_i32_1 = arith.constant 0 : i32
    return %c0_i32, %c0_i32_0 : i32, i32
  }
}

</mosaic_0001>

<bundles_post_ra>
// kernel: _grouped_conv3d_impl.1
= control target key start
LH: loop header
LB: loop body
LE: loop exit
PB: predicated region body
PF: predicated region fallthrough
CT: control target
= control target key end

     0   :  { %s1018_s16 = smov 1   ;;  %s1957_s0 = inlined_call_operand.vmem [shape: f32[256,1024], index: 0, kind: input, shape index: {}]   ;;  %s1958_s1 = inlined_call_operand.vmem [shape: f32[16,256], index: 1, kind: input, shape index: {}]   ;;  %s1959_s2 = inlined_call_operand.vmem [shape: f32[16,2], index: 2, kind: input, shape index: {}]   ;;  %s1960_s3 = inlined_call_operand.vmem [shape: f32[16,256], index: 3, kind: output, shape index: {}]  }
   0x1   :  { %v19_v0 = vld [vmem:[%s1957_s0 + $0x8] sm:$0xff]  ;;  %v18_v2 = vld [vmem:[%s1957_s0] sm:$0xff]  ;;  %v21_v5 = vld [vmem:[%s1957_s0 + $0x18] sm:$0xff] }
   0x2   :  { %v27_v1 = vld [vmem:[%s1957_s0 + $0x48] sm:$0xff]  ;;  %v26_v4 = vld [vmem:[%s1957_s0 + $0x40] sm:$0xff]  ;;  %v29_v6 = vld [vmem:[%s1957_s0 + $0x58] sm:$0xff] }
   0x3   :  { %v750_v3 = vpack.c.bf16 %v27_v1, %v19_v0  ;;  %v752_v7 = vpack.c.bf16 %v26_v4, %v18_v2  ;;  %v814_v8 = vpack.c.bf16 %v29_v6, %v21_v5  ;;  %v35_v9 = vld [vmem:[%s1957_s0 + $0x88] sm:$0xff]  ;;  %v20_v11 = vld [vmem:[%s1957_s0 + $0x10] sm:$0xff]  ;;  %v34_v14 = vld [vmem:[%s1957_s0 + $0x80] sm:$0xff] }
   0x4   :  { %v43_v10 = vld [vmem:[%s1957_s0 + $0xc8] sm:$0xff]  ;;  %v28_v13 = vld [vmem:[%s1957_s0 + $0x50] sm:$0xff]  ;;  %v42_v15 = vld [vmem:[%s1957_s0 + $0xc0] sm:$0xff] }
   0x5   :  { %751 = vmatprep.subr.bf16.mxu0 %v750_v3  ;;  %v754_v12 = vpack.c.bf16 %v43_v10, %v35_v9  ;;  %815 = vmatprep.subr.bf16.mxu1 %v814_v8  ;;  %v816_v16 = vpack.c.bf16 %v28_v13, %v20_v11  ;;  %v756_v17 = vpack.c.bf16 %v42_v15, %v34_v14  ;;  %v37_v18 = vld [vmem:[%s1957_s0 + $0x98] sm:$0xff]  ;;  %v51_v20 = vld [vmem:[%s1957_s0 + $0x108] sm:$0xff]  ;;  %v36_v23 = vld [vmem:[%s1957_s0 + $0x90] sm:$0xff] }
   0x6   :  { %753 = vmatpush1.bf16.msra.mxu0 %v752_v7  ;;  %v45_v19 = vld [vmem:[%s1957_s0 + $0xd8] sm:$0xff]  ;;  %v59_v22 = vld [vmem:[%s1957_s0 + $0x148] sm:$0xff]  ;;  %v44_v24 = vld [vmem:[%s1957_s0 + $0xd0] sm:$0xff] }
   0x7   :  { %755 = vmatprep.subr.bf16.mxu0 %v754_v12  ;;  %v818_v21 = vpack.c.bf16 %v45_v19, %v37_v18  ;;  %817 = vmatpush1.bf16.msra.mxu1 %v816_v16  ;;  %v758_v25 = vpack.c.bf16 %v59_v22, %v51_v20  ;;  %v820_v26 = vpack.c.bf16 %v44_v24, %v36_v23  ;;  %v50_v27 = vld [vmem:[%s1957_s0 + $0x100] sm:$0xff]  ;;  %v53_v29 = vld [vmem:[%s1957_s0 + $0x118] sm:$0xff]  ;;  %v67_v31 = vld [vmem:[%s1957_s0 + $0x188] sm:$0xff] }
   0x8   :  { %v58_v28 = vld [vmem:[%s1957_s0 + $0x140] sm:$0xff]  ;;  %v61_v30 = vld [vmem:[%s1957_s0 + $0x158] sm:$0xff]  ;;  %v75_v32 = vld [vmem:[%s1957_s0 + $0x1c8] sm:$0xff] }
   0x9   :  { %819 = vmatprep.subr.bf16.mxu1 %v818_v21  ;;  %v760_v33 = vpack.c.bf16 %v58_v28, %v50_v27  ;;  %v822_v34 = vpack.c.bf16 %v61_v30, %v53_v29  ;;  %v52_v35 = vld [vmem:[%s1957_s0 + $0x110] sm:$0xff]  ;;  %v66_v37 = vld [vmem:[%s1957_s0 + $0x180] sm:$0xff]  ;;  %v762_v38 = vpack.c.bf16 %v75_v32, %v67_v31  ;;  %v69_v40 = vld [vmem:[%s1957_s0 + $0x198] sm:$0xff] }
   0xa   :  { %757 = vmatpush1.bf16.msra.mxu0 %v756_v17  ;;  %v60_v36 = vld [vmem:[%s1957_s0 + $0x150] sm:$0xff]  ;;  %v74_v39 = vld [vmem:[%s1957_s0 + $0x1c0] sm:$0xff]  ;;  %v77_v41 = vld [vmem:[%s1957_s0 + $0x1d8] sm:$0xff] }
   0xb   :  { %759 = vmatprep.subr.bf16.mxu0 %v758_v25  ;;  %821 = vmatpush1.bf16.msra.mxu1 %v820_v26  ;;  %v824_v42 = vpack.c.bf16 %v60_v36, %v52_v35  ;;  %v83_v43 = vld [vmem:[%s1957_s0 + $0x208] sm:$0xff]  ;;  %v826_v45 = vpack.c.bf16 %v77_v41, %v69_v40  ;;  %v68_v46 = vld [vmem:[%s1957_s0 + $0x190] sm:$0xff]  ;;  %v764_v48 = vpack.c.bf16 %v74_v39, %v66_v37  ;;  %v85_v49 = vld [vmem:[%s1957_s0 + $0x218] sm:$0xff] }
   0xc   :  { %v91_v44 = vld [vmem:[%s1957_s0 + $0x248] sm:$0xff]  ;;  %823 = vmatprep.subr.bf16.mxu1 %v822_v34  ;;  %v76_v47 = vld [vmem:[%s1957_s0 + $0x1d0] sm:$0xff]  ;;  %v93_v50 = vld [vmem:[%s1957_s0 + $0x258] sm:$0xff] }
   0xd   :  { %v766_v51 = vpack.c.bf16 %v91_v44, %v83_v43  ;;  %v82_v52 = vld [vmem:[%s1957_s0 + $0x200] sm:$0xff]  ;;  %v828_v54 = vpack.c.bf16 %v76_v47, %v68_v46  ;;  %v99_v55 = vld [vmem:[%s1957_s0 + $0x288] sm:$0xff]  ;;  %v830_v57 = vpack.c.bf16 %v93_v50, %v85_v49  ;;  %v84_v58 = vld [vmem:[%s1957_s0 + $0x210] sm:$0xff] }
   0xe   :  { %761 = vmatpush1.bf16.msra.mxu0 %v760_v33  ;;  %v90_v53 = vld [vmem:[%s1957_s0 + $0x240] sm:$0xff]  ;;  %v107_v56 = vld [vmem:[%s1957_s0 + $0x2c8] sm:$0xff]  ;;  %v92_v59 = vld [vmem:[%s1957_s0 + $0x250] sm:$0xff] }
   0xf   :  { %763 = vmatprep.subr.bf16.mxu0 %v762_v38  ;;  %825 = vmatpush1.bf16.msra.mxu1 %v824_v42  ;;  %v768_v60 = vpack.c.bf16 %v90_v53, %v82_v52  ;;  %v101_v61 = vld [vmem:[%s1957_s0 + $0x298] sm:$0xff]  ;;  %v770_v63 = vpack.c.bf16 %v107_v56, %v99_v55  ;;  %v98_v0 = vld [vmem:[%s1957_s0 + $0x280] sm:$0xff]  ;;  %v832_v2 = vpack.c.bf16 %v92_v59, %v84_v58  ;;  %v115_v3 = vld [vmem:[%s1957_s0 + $0x308] sm:$0xff] }
  0x10   :  { %827 = vmatprep.subr.bf16.mxu1 %v826_v45  ;;  %v109_v62 = vld [vmem:[%s1957_s0 + $0x2d8] sm:$0xff]  ;;  %v106_v1 = vld [vmem:[%s1957_s0 + $0x2c0] sm:$0xff]  ;;  %v123_v4 = vld [vmem:[%s1957_s0 + $0x348] sm:$0xff] }
  0x11   :  { %v834_v5 = vpack.c.bf16 %v109_v62, %v101_v61  ;;  %v100_v6 = vld [vmem:[%s1957_s0 + $0x290] sm:$0xff]  ;;  %v772_v8 = vpack.c.bf16 %v106_v1, %v98_v0  ;;  %v117_v9 = vld [vmem:[%s1957_s0 + $0x318] sm:$0xff]  ;;  %v774_v11 = vpack.c.bf16 %v123_v4, %v115_v3  ;;  %v114_v12 = vld [vmem:[%s1957_s0 + $0x300] sm:$0xff] }
  0x12   :  { %765 = vmatpush1.bf16.msra.mxu0 %v764_v48  ;;  %v108_v7 = vld [vmem:[%s1957_s0 + $0x2d0] sm:$0xff]  ;;  %v125_v10 = vld [vmem:[%s1957_s0 + $0x358] sm:$0xff]  ;;  %v122_v13 = vld [vmem:[%s1957_s0 + $0x340] sm:$0xff] }
  0x13   :  { %767 = vmatprep.subr.bf16.mxu0 %v766_v51  ;;  %829 = vmatpush1.bf16.msra.mxu1 %v828_v54  ;;  %v836_v14 = vpack.c.bf16 %v108_v7, %v100_v6  ;;  %v131_v15 = vld [vmem:[%s1957_s0 + $0x388] sm:$0xff]  ;;  %v838_v17 = vpack.c.bf16 %v125_v10, %v117_v9  ;;  %v116_v18 = vld [vmem:[%s1957_s0 + $0x310] sm:$0xff]  ;;  %v776_v20 = vpack.c.bf16 %v122_v13, %v114_v12  ;;  %v133_v21 = vld [vmem:[%s1957_s0 + $0x398] sm:$0xff] }
  0x14   :  { %831 = vmatprep.subr.bf16.mxu1 %v830_v57  ;;  %v139_v16 = vld [vmem:[%s1957_s0 + $0x3c8] sm:$0xff]  ;;  %v124_v19 = vld [vmem:[%s1957_s0 + $0x350] sm:$0xff]  ;;  %v141_v22 = vld [vmem:[%s1957_s0 + $0x3d8] sm:$0xff] }
  0x15   :  { %v778_v23 = vpack.c.bf16 %v139_v16, %v131_v15  ;;  %v130_v24 = vld [vmem:[%s1957_s0 + $0x380] sm:$0xff]  ;;  %v840_v26 = vpack.c.bf16 %v124_v19, %v116_v18  ;;  %v147_v27 = vld [vmem:[%s1957_s0 + $0x408] sm:$0xff]  ;;  %v842_v29 = vpack.c.bf16 %v141_v22, %v133_v21  ;;  %v132_v30 = vld [vmem:[%s1957_s0 + $0x390] sm:$0xff] }
  0x16   :  { %769 = vmatpush1.bf16.msra.mxu0 %v768_v60  ;;  %v138_v25 = vld [vmem:[%s1957_s0 + $0x3c0] sm:$0xff]  ;;  %v155_v28 = vld [vmem:[%s1957_s0 + $0x448] sm:$0xff]  ;;  %v140_v31 = vld [vmem:[%s1957_s0 + $0x3d0] sm:$0xff] }
  0x17   :  { %771 = vmatprep.subr.bf16.mxu0 %v770_v63  ;;  %833 = vmatpush1.bf16.msra.mxu1 %v832_v2  ;;  %v780_v32 = vpack.c.bf16 %v138_v25, %v130_v24  ;;  %v149_v33 = vld [vmem:[%s1957_s0 + $0x418] sm:$0xff]  ;;  %v782_v35 = vpack.c.bf16 %v155_v28, %v147_v27  ;;  %v146_v36 = vld [vmem:[%s1957_s0 + $0x400] sm:$0xff]  ;;  %v844_v38 = vpack.c.bf16 %v140_v31, %v132_v30  ;;  %v163_v39 = vld [vmem:[%s1957_s0 + $0x488] sm:$0xff] }
  0x18   :  { %835 = vmatprep.subr.bf16.mxu1 %v834_v5  ;;  %v157_v34 = vld [vmem:[%s1957_s0 + $0x458] sm:$0xff]  ;;  %v154_v37 = vld [vmem:[%s1957_s0 + $0x440] sm:$0xff]  ;;  %v171_v40 = vld [vmem:[%s1957_s0 + $0x4c8] sm:$0xff] }
  0x19   :  { %v846_v41 = vpack.c.bf16 %v157_v34, %v149_v33  ;;  %v148_v42 = vld [vmem:[%s1957_s0 + $0x410] sm:$0xff]  ;;  %v784_v44 = vpack.c.bf16 %v154_v37, %v146_v36  ;;  %v165_v45 = vld [vmem:[%s1957_s0 + $0x498] sm:$0xff]  ;;  %v786_v47 = vpack.c.bf16 %v171_v40, %v163_v39  ;;  %v162_v48 = vld [vmem:[%s1957_s0 + $0x480] sm:$0xff] }
  0x1a   :  { %773 = vmatpush1.bf16.msra.mxu0 %v772_v8  ;;  %v156_v43 = vld [vmem:[%s1957_s0 + $0x450] sm:$0xff]  ;;  %v173_v46 = vld [vmem:[%s1957_s0 + $0x4d8] sm:$0xff]  ;;  %v170_v49 = vld [vmem:[%s1957_s0 + $0x4c0] sm:$0xff] }
  0x1b   :  { %775 = vmatprep.subr.bf16.mxu0 %v774_v11  ;;  %837 = vmatpush1.bf16.msra.mxu1 %v836_v14  ;;  %v848_v50 = vpack.c.bf16 %v156_v43, %v148_v42  ;;  %v179_v51 = vld [vmem:[%s1957_s0 + $0x508] sm:$0xff]  ;;  %v850_v53 = vpack.c.bf16 %v173_v46, %v165_v45  ;;  %v164_v54 = vld [vmem:[%s1957_s0 + $0x490] sm:$0xff]  ;;  %v788_v56 = vpack.c.bf16 %v170_v49, %v162_v48  ;;  %v181_v57 = vld [vmem:[%s1957_s0 + $0x518] sm:$0xff] }
  0x1c   :  { %839 = vmatprep.subr.bf16.mxu1 %v838_v17  ;;  %v187_v52 = vld [vmem:[%s1957_s0 + $0x548] sm:$0xff]  ;;  %v172_v55 = vld [vmem:[%s1957_s0 + $0x4d0] sm:$0xff]  ;;  %v189_v58 = vld [vmem:[%s1957_s0 + $0x558] sm:$0xff] }
  0x1d   :  { %v790_v59 = vpack.c.bf16 %v187_v52, %v179_v51  ;;  %v178_v60 = vld [vmem:[%s1957_s0 + $0x500] sm:$0xff]  ;;  %v852_v62 = vpack.c.bf16 %v172_v55, %v164_v54  ;;  %v195_v63 = vld [vmem:[%s1957_s0 + $0x588] sm:$0xff]  ;;  %v854_v1 = vpack.c.bf16 %v189_v58, %v181_v57  ;;  %v180_v2 = vld [vmem:[%s1957_s0 + $0x510] sm:$0xff] }
  0x1e   :  { %777 = vmatpush1.bf16.msra.mxu0 %v776_v20  ;;  %v186_v61 = vld [vmem:[%s1957_s0 + $0x540] sm:$0xff]  ;;  %v203_v0 = vld [vmem:[%s1957_s0 + $0x5c8] sm:$0xff]  ;;  %v188_v3 = vld [vmem:[%s1957_s0 + $0x550] sm:$0xff] }
  0x1f   :  { %779 = vmatprep.subr.bf16.mxu0 %v778_v23  ;;  %841 = vmatpush1.bf16.msra.mxu1 %v840_v26  ;;  %v792_v4 = vpack.c.bf16 %v186_v61, %v178_v60  ;;  %v197_v5 = vld [vmem:[%s1957_s0 + $0x598] sm:$0xff]  ;;  %v794_v7 = vpack.c.bf16 %v203_v0, %v195_v63  ;;  %v194_v8 = vld [vmem:[%s1957_s0 + $0x580] sm:$0xff]  ;;  %v1324_v10 = vld [vmem:[%s1958_s1 + $0x8] sm:$0xff]  ;;  %v856_v11 = vpack.c.bf16 %v188_v3, %v180_v2 }
  0x20   :  { %843 = vmatprep.subr.bf16.mxu1 %v842_v29  ;;  %v205_v6 = vld [vmem:[%s1957_s0 + $0x5d8] sm:$0xff]  ;;  %v202_v9 = vld [vmem:[%s1957_s0 + $0x5c0] sm:$0xff]  ;;  %v211_v12 = vld [vmem:[%s1957_s0 + $0x608] sm:$0xff]  ;;  %338 = vmatprep.mubr.f32.mxu0 %v1324_v10 }
  0x21   :  { %v219_v13 = vld [vmem:[%s1957_s0 + $0x648] sm:$0xff]  ;;  %v858_v14 = vpack.c.bf16 %v205_v6, %v197_v5  ;;  %v196_v15 = vld [vmem:[%s1957_s0 + $0x590] sm:$0xff]  ;;  %415 = vmatprep.mubr.f32.mxu1 %v1324_v10  ;;  %v796_v17 = vpack.c.bf16 %v202_v9, %v194_v8  ;;  %v213_v18 = vld [vmem:[%s1957_s0 + $0x618] sm:$0xff] }
  0x22   :  { %781 = vmatpush1.bf16.msra.mxu0 %v780_v32  ;;  %v204_v16 = vld [vmem:[%s1957_s0 + $0x5d0] sm:$0xff]  ;;  %v221_v19 = vld [vmem:[%s1957_s0 + $0x658] sm:$0xff]  ;;  %v798_v20 = vpack.c.bf16 %v219_v13, %v211_v12  ;;  %v210_v21 = vld [vmem:[%s1957_s0 + $0x600] sm:$0xff] }
  0x23   :  { %783 = vmatprep.subr.bf16.mxu0 %v782_v35  ;;  %845 = vmatpush1.bf16.msra.mxu1 %v844_v38  ;;  %v218_v22 = vld [vmem:[%s1957_s0 + $0x640] sm:$0xff]  ;;  %v860_v23 = vpack.c.bf16 %v204_v16, %v196_v15  ;;  %v227_v24 = vld [vmem:[%s1957_s0 + $0x688] sm:$0xff]  ;;  %v862_v26 = vpack.c.bf16 %v221_v19, %v213_v18  ;;  %v212_v27 = vld [vmem:[%s1957_s0 + $0x610] sm:$0xff] }
  0x24   :  { %847 = vmatprep.subr.bf16.mxu1 %v846_v41  ;;  %v235_v25 = vld [vmem:[%s1957_s0 + $0x6c8] sm:$0xff]  ;;  %v220_v28 = vld [vmem:[%s1957_s0 + $0x650] sm:$0xff]  ;;  %v800_v29 = vpack.c.bf16 %v218_v22, %v210_v21  ;;  %v229_v30 = vld [vmem:[%s1957_s0 + $0x698] sm:$0xff] }
  0x25   :  { %v237_v31 = vld [vmem:[%s1957_s0 + $0x6d8] sm:$0xff]  ;;  %v802_v32 = vpack.c.bf16 %v235_v25, %v227_v24  ;;  %v226_v33 = vld [vmem:[%s1957_s0 + $0x680] sm:$0xff]  ;;  %v864_v35 = vpack.c.bf16 %v220_v28, %v212_v27  ;;  %v243_v36 = vld [vmem:[%s1957_s0 + $0x708] sm:$0xff] }
  0x26   :  { %785 = vmatpush1.bf16.msra.mxu0 %v784_v44  ;;  %v234_v34 = vld [vmem:[%s1957_s0 + $0x6c0] sm:$0xff]  ;;  %v251_v37 = vld [vmem:[%s1957_s0 + $0x748] sm:$0xff]  ;;  %v866_v38 = vpack.c.bf16 %v237_v31, %v229_v30  ;;  %v228_v39 = vld [vmem:[%s1957_s0 + $0x690] sm:$0xff] }
  0x27   :  { %787 = vmatprep.subr.bf16.mxu0 %v786_v47  ;;  %849 = vmatpush1.bf16.msra.mxu1 %v848_v50  ;;  %v236_v40 = vld [vmem:[%s1957_s0 + $0x6d0] sm:$0xff]  ;;  %v804_v41 = vpack.c.bf16 %v234_v34, %v226_v33  ;;  %v245_v42 = vld [vmem:[%s1957_s0 + $0x718] sm:$0xff]  ;;  %v806_v44 = vpack.c.bf16 %v251_v37, %v243_v36  ;;  %v242_v45 = vld [vmem:[%s1957_s0 + $0x700] sm:$0xff] }
  0x28   :  { %851 = vmatprep.subr.bf16.mxu1 %v850_v53  ;;  %v253_v43 = vld [vmem:[%s1957_s0 + $0x758] sm:$0xff]  ;;  %v250_v46 = vld [vmem:[%s1957_s0 + $0x740] sm:$0xff]  ;;  %v868_v47 = vpack.c.bf16 %v236_v40, %v228_v39  ;;  %v259_v48 = vld [vmem:[%s1957_s0 + $0x788] sm:$0xff] }
  0x29   :  { %v267_v49 = vld [vmem:[%s1957_s0 + $0x7c8] sm:$0xff]  ;;  %v870_v50 = vpack.c.bf16 %v253_v43, %v245_v42  ;;  %v244_v51 = vld [vmem:[%s1957_s0 + $0x710] sm:$0xff]  ;;  %v808_v53 = vpack.c.bf16 %v250_v46, %v242_v45  ;;  %v261_v54 = vld [vmem:[%s1957_s0 + $0x798] sm:$0xff] }
  0x2a   :  { %789 = vmatpush1.bf16.msra.mxu0 %v788_v56  ;;  %v252_v52 = vld [vmem:[%s1957_s0 + $0x750] sm:$0xff]  ;;  %v269_v55 = vld [vmem:[%s1957_s0 + $0x7d8] sm:$0xff]  ;;  %v810_v56 = vpack.c.bf16 %v267_v49, %v259_v48  ;;  %v258_v57 = vld [vmem:[%s1957_s0 + $0x780] sm:$0xff] }
  0x2b   :  { %791 = vmatprep.subr.bf16.mxu0 %v790_v59  ;;  %853 = vmatpush1.bf16.msra.mxu1 %v852_v62  ;;  %v266_v58 = vld [vmem:[%s1957_s0 + $0x7c0] sm:$0xff]  ;;  %v872_v59 = vpack.c.bf16 %v252_v52, %v244_v51  ;;  %v23_v60 = vld [vmem:[%s1957_s0 + $0x28] sm:$0xff]  ;;  %v874_v62 = vpack.c.bf16 %v269_v55, %v261_v54  ;;  %v260_v63 = vld [vmem:[%s1957_s0 + $0x790] sm:$0xff] }
  0x2c   :  { %855 = vmatprep.subr.bf16.mxu1 %v854_v1  ;;  %v31_v61 = vld [vmem:[%s1957_s0 + $0x68] sm:$0xff]  ;;  %v268_v0 = vld [vmem:[%s1957_s0 + $0x7d0] sm:$0xff]  ;;  %v812_v1 = vpack.c.bf16 %v266_v58, %v258_v57  ;;  %v25_v2 = vld [vmem:[%s1957_s0 + $0x38] sm:$0xff] }
  0x2d   :  { %v33_v3 = vld [vmem:[%s1957_s0 + $0x78] sm:$0xff]  ;;  %v22_v5 = vld [vmem:[%s1957_s0 + $0x20] sm:$0xff]  ;;  %v39_v8 = vld [vmem:[%s1957_s0 + $0xa8] sm:$0xff] }
  0x2e   :  { %793 = vmatpush1.bf16.msra.mxu0 %v792_v4  ;;  %v878_v4 = vpack.c.bf16 %v31_v61, %v23_v60  ;;  %v30_v6 = vld [vmem:[%s1957_s0 + $0x60] sm:$0xff]  ;;  %v47_v9 = vld [vmem:[%s1957_s0 + $0xe8] sm:$0xff]  ;;  %v24_v12 = vld [vmem:[%s1957_s0 + $0x30] sm:$0xff] }
  0x2f   :  { %795 = vmatprep.subr.bf16.mxu0 %v794_v7  ;;  %857 = vmatpush1.bf16.msra.mxu1 %v856_v11  ;;  %v876_v7 = vpack.c.bf16 %v268_v0, %v260_v63  ;;  %v942_v11 = vpack.c.bf16 %v33_v3, %v25_v2  ;;  %v32_v13 = vld [vmem:[%s1957_s0 + $0x70] sm:$0xff]  ;;  %v880_v15 = vpack.c.bf16 %v30_v6, %v22_v5  ;;  %v41_v16 = vld [vmem:[%s1957_s0 + $0xb8] sm:$0xff]  ;;  %v38_v19 = vld [vmem:[%s1957_s0 + $0xa0] sm:$0xff] }
  0x30   :  { %859 = vmatprep.subr.bf16.mxu1 %v858_v14  ;;  %v1463_v14 = vld [vmem:[%s1958_s1] sm:$0xff]  ;;  %v882_v18 = vpack.c.bf16 %v47_v9, %v39_v8  ;;  %v944_v21 = vpack.c.bf16 %v32_v13, %v24_v12  ;;  %v55_v22 = vld [vmem:[%s1957_s0 + $0x128] sm:$0xff]  ;;  %v40_v25 = vld [vmem:[%s1957_s0 + $0xb0] sm:$0xff] }
  0x31   :  { %v57_v28 = vld [vmem:[%s1957_s0 + $0x138] sm:$0xff]  ;;  %v54_v31 = vld [vmem:[%s1957_s0 + $0x120] sm:$0xff]  ;;  %v71_v34 = vld [vmem:[%s1957_s0 + $0x1a8] sm:$0xff] }
  0x32   :  { %797 = vmatpush1.bf16.msra.mxu0 %v796_v17  ;;  %v49_v17 = vld [vmem:[%s1957_s0 + $0xf8] sm:$0xff]  ;;  %v56_v37 = vld [vmem:[%s1957_s0 + $0x130] sm:$0xff]  ;;  %v70_v43 = vld [vmem:[%s1957_s0 + $0x1a0] sm:$0xff] }
  0x33   :  { %799 = vmatprep.subr.bf16.mxu0 %v798_v20  ;;  %861 = vmatpush1.bf16.msra.mxu1 %v860_v23  ;;  %v46_v20 = vld [vmem:[%s1957_s0 + $0xe0] sm:$0xff]  ;;  %v63_v23 = vld [vmem:[%s1957_s0 + $0x168] sm:$0xff]  ;;  %v946_v24 = vpack.c.bf16 %v49_v17, %v41_v16  ;;  %v73_v40 = vld [vmem:[%s1957_s0 + $0x1b8] sm:$0xff] }
  0x34   :  { %863 = vmatprep.subr.bf16.mxu1 %v862_v26  ;;  %v48_v26 = vld [vmem:[%s1957_s0 + $0xf0] sm:$0xff]  ;;  %v884_v27 = vpack.c.bf16 %v46_v20, %v38_v19  ;;  %v886_v30 = vpack.c.bf16 %v63_v23, %v55_v22  ;;  %v87_v46 = vld [vmem:[%s1957_s0 + $0x228] sm:$0xff]  ;;  %v89_v52 = vld [vmem:[%s1957_s0 + $0x238] sm:$0xff] }
  0x35   :  { %v948_v33 = vpack.c.bf16 %v48_v26, %v40_v25  ;;  %v72_v49 = vld [vmem:[%s1957_s0 + $0x1b0] sm:$0xff]  ;;  %v86_v55 = vld [vmem:[%s1957_s0 + $0x220] sm:$0xff]  ;;  %v103_v58 = vld [vmem:[%s1957_s0 + $0x2a8] sm:$0xff] }
  0x36   :  { %801 = vmatpush1.bf16.msra.mxu0 %v800_v29  ;;  %v65_v29 = vld [vmem:[%s1957_s0 + $0x178] sm:$0xff]  ;;  %v88_v61 = vld [vmem:[%s1957_s0 + $0x230] sm:$0xff]  ;;  %v102_v3 = vld [vmem:[%s1957_s0 + $0x2a0] sm:$0xff] }
  0x37   :  { %803 = vmatprep.subr.bf16.mxu0 %v802_v32  ;;  %865 = vmatpush1.bf16.msra.mxu1 %v864_v35  ;;  %v62_v32 = vld [vmem:[%s1957_s0 + $0x160] sm:$0xff]  ;;  %v79_v35 = vld [vmem:[%s1957_s0 + $0x1e8] sm:$0xff]  ;;  %v950_v36 = vpack.c.bf16 %v65_v29, %v57_v28  ;;  %v105_v0 = vld [vmem:[%s1957_s0 + $0x2b8] sm:$0xff] }
  0x38   :  { %867 = vmatprep.subr.bf16.mxu1 %v866_v38  ;;  %v64_v38 = vld [vmem:[%s1957_s0 + $0x170] sm:$0xff]  ;;  %v888_v39 = vpack.c.bf16 %v62_v32, %v54_v31  ;;  %v890_v42 = vpack.c.bf16 %v79_v35, %v71_v34  ;;  %v119_v5 = vld [vmem:[%s1957_s0 + $0x328] sm:$0xff]  ;;  %v1584_v8 = vld [vmem:[%s1958_s1 + $0x18] sm:$0xff] }
  0x39   :  { %v952_v45 = vpack.c.bf16 %v64_v38, %v56_v37  ;;  %v1589_v9 = vld [vmem:[%s1958_s1 + $0x10] sm:$0xff]  ;;  %v121_v16 = vld [vmem:[%s1957_s0 + $0x338] sm:$0xff]  ;;  %v118_v19 = vld [vmem:[%s1957_s0 + $0x320] sm:$0xff] }
  0x3a   :  { %805 = vmatpush1.bf16.msra.mxu0 %v804_v41  ;;  %v81_v41 = vld [vmem:[%s1957_s0 + $0x1f8] sm:$0xff]  ;;  %v104_v12 = vld [vmem:[%s1957_s0 + $0x2b0] sm:$0xff]  ;;  %v126_v20 = vld [vmem:[%s1957_s0 + $0x360] sm:$0xff] }
  0x3b   :  { %807 = vmatprep.subr.bf16.mxu0 %v806_v44  ;;  %869 = vmatpush1.bf16.msra.mxu1 %v868_v47  ;;  %v78_v44 = vld [vmem:[%s1957_s0 + $0x1e0] sm:$0xff]  ;;  %v95_v47 = vld [vmem:[%s1957_s0 + $0x268] sm:$0xff]  ;;  %v954_v48 = vpack.c.bf16 %v81_v41, %v73_v40  ;;  %v112_v13 = vld [vmem:[%s1957_s0 + $0x2f0] sm:$0xff] }
  0x3c   :  { %871 = vmatprep.subr.bf16.mxu1 %v870_v50  ;;  %v80_v50 = vld [vmem:[%s1957_s0 + $0x1f0] sm:$0xff]  ;;  %v892_v51 = vpack.c.bf16 %v78_v44, %v70_v43  ;;  %v894_v54 = vpack.c.bf16 %v95_v47, %v87_v46  ;;  %v129_v17 = vld [vmem:[%s1957_s0 + $0x378] sm:$0xff]  ;;  %v135_v22 = vld [vmem:[%s1957_s0 + $0x3a8] sm:$0xff] }
  0x3d   :  { %v956_v57 = vpack.c.bf16 %v80_v50, %v72_v49  ;;  %v143_v23 = vld [vmem:[%s1957_s0 + $0x3e8] sm:$0xff]  ;;  %v120_v25 = vld [vmem:[%s1957_s0 + $0x330] sm:$0xff]  ;;  %v137_v28 = vld [vmem:[%s1957_s0 + $0x3b8] sm:$0xff] }
  0x3e   :  { %809 = vmatpush1.bf16.msra.mxu0 %v808_v53  ;;  %v97_v53 = vld [vmem:[%s1957_s0 + $0x278] sm:$0xff]  ;;  %v128_v26 = vld [vmem:[%s1957_s0 + $0x370] sm:$0xff]  ;;  %v134_v31 = vld [vmem:[%s1957_s0 + $0x3a0] sm:$0xff] }
  0x3f   :  { %811 = vmatprep.subr.bf16.mxu0 %v810_v56  ;;  %873 = vmatpush1.bf16.msra.mxu1 %v872_v59  ;;  %v94_v56 = vld [vmem:[%s1957_s0 + $0x260] sm:$0xff]  ;;  %v111_v59 = vld [vmem:[%s1957_s0 + $0x2e8] sm:$0xff]  ;;  %v958_v60 = vpack.c.bf16 %v97_v53, %v89_v52  ;;  %v145_v29 = vld [vmem:[%s1957_s0 + $0x3f8] sm:$0xff] }
  0x40   :  { %875 = vmatprep.subr.bf16.mxu1 %v874_v62  ;;  %v96_v62 = vld [vmem:[%s1957_s0 + $0x270] sm:$0xff]  ;;  %v896_v63 = vpack.c.bf16 %v94_v56, %v86_v55  ;;  %v898_v2 = vpack.c.bf16 %v111_v59, %v103_v58  ;;  %v142_v32 = vld [vmem:[%s1957_s0 + $0x3e0] sm:$0xff]  ;;  %v151_v34 = vld [vmem:[%s1957_s0 + $0x428] sm:$0xff]  ;;  %v970_v35 = vpack.c.bf16 %v145_v29, %v137_v28 }
  0x41   :  { %v960_v6 = vpack.c.bf16 %v96_v62, %v88_v61  ;;  %v144_v37 = vld [vmem:[%s1957_s0 + $0x3f0] sm:$0xff]  ;;  %v908_v38 = vpack.c.bf16 %v142_v32, %v134_v31  ;;  %v161_v40 = vld [vmem:[%s1957_s0 + $0x478] sm:$0xff]  ;;  %v158_v43 = vld [vmem:[%s1957_s0 + $0x460] sm:$0xff] }
  0x42   :  { %813 = vmatpush1.bf16.msra.mxu0 %v812_v1  ;;  %v113_v1 = vld [vmem:[%s1957_s0 + $0x2f8] sm:$0xff]  ;;  %v175_v46 = vld [vmem:[%s1957_s0 + $0x4e8] sm:$0xff]  ;;  %v160_v49 = vld [vmem:[%s1957_s0 + $0x470] sm:$0xff] }
  0x43   :  { %879 = vmatprep.subr.bf16.mxu0 %v878_v4  ;;  %877 = vmatpush1.bf16.msra.mxu1 %v876_v7  ;;  %v110_v4 = vld [vmem:[%s1957_s0 + $0x2e0] sm:$0xff]  ;;  %v127_v7 = vld [vmem:[%s1957_s0 + $0x368] sm:$0xff]  ;;  %v177_v52 = vld [vmem:[%s1957_s0 + $0x4f8] sm:$0xff] }
  0x44   :  { %943 = vmatprep.subr.bf16.mxu1 %v942_v11  ;;  %v962_v11 = vpack.c.bf16 %v113_v1, %v105_v0  ;;  %v174_v55 = vld [vmem:[%s1957_s0 + $0x4e0] sm:$0xff]  ;;  %v191_v58 = vld [vmem:[%s1957_s0 + $0x568] sm:$0xff]  ;;  %v176_v61 = vld [vmem:[%s1957_s0 + $0x4f0] sm:$0xff] }
  0x45   :  { %339 = vmatmul.mubr.f32.vlgmr.msra.gmra.mrb[0].mxu0 %v1463_v14  ;;  %v193_v0 = vld [vmem:[%s1957_s0 + $0x578] sm:$0xff]  ;;  %v222_v31 = vld [vmem:[%s1957_s0 + $0x660] sm:$0xff] }
  0x46   :  { %881 = vmatpush1.bf16.msra.mxu0 %v880_v15  ;;  %416 = vmatmul.mubr.f32.vlgmr.msra.gmra.mrb[0].mxu1 %v1463_v14  ;;  %v900_v15 = vpack.c.bf16 %v110_v4, %v102_v3  ;;  %v190_v3 = vld [vmem:[%s1957_s0 + $0x560] sm:$0xff]  ;;  %v225_v28 = vld [vmem:[%s1957_s0 + $0x678] sm:$0xff] }
  0x47   :  { %883 = vmatprep.subr.bf16.mxu0 %v882_v18  ;;  %945 = vmatpush1.bf16.msra.mxu1 %v944_v21  ;;  %v902_v18 = vpack.c.bf16 %v127_v7, %v119_v5  ;;  %v964_v21 = vpack.c.bf16 %v112_v13, %v104_v12  ;;  %v199_v5 = vld [vmem:[%s1957_s0 + $0x5a8] sm:$0xff]  ;;  %v192_v12 = vld [vmem:[%s1957_s0 + $0x570] sm:$0xff] }
  0x48   :  { %947 = vmatprep.subr.bf16.mxu1 %v946_v24  ;;  %344 = vmatprep.mubr.f32.mxu0 %v1584_v8  ;;  %v966_v24 = vpack.c.bf16 %v129_v17, %v121_v16  ;;  %v209_v16 = vld [vmem:[%s1957_s0 + $0x5f8] sm:$0xff] }
  0x49   :  { %421 = vmatprep.mubr.f32.mxu1 %v1584_v8  ;;  %345 = vmatmul.mubr.f32.gmra.mrb[2].mxu0 %v1589_v9 }
  0x4a   :  { %885 = vmatpush1.bf16.msra.mxu0 %v884_v27  ;;  %492 = vmatprep.mubr.f32.mxu0 %v1324_v10  ;;  %v904_v27 = vpack.c.bf16 %v126_v20, %v118_v19  ;;  %v206_v19 = vld [vmem:[%s1957_s0 + $0x5e0] sm:$0xff] }
  0x4b   :  { %887 = vmatprep.subr.bf16.mxu0 %v886_v30  ;;  %949 = vmatpush1.bf16.msra.mxu1 %v948_v33  ;;  %v906_v30 = vpack.c.bf16 %v143_v23, %v135_v22  ;;  %v968_v33 = vpack.c.bf16 %v128_v26, %v120_v25  ;;  %v223_v22 = vld [vmem:[%s1957_s0 + $0x668] sm:$0xff]  ;;  %v208_v25 = vld [vmem:[%s1957_s0 + $0x5f0] sm:$0xff] }
  0x4c   :  { %951 = vmatprep.subr.bf16.mxu1 %v950_v36  ;;  %422 = vmatmul.mubr.f32.gmra.mrb[2].mxu1 %v1589_v9  ;;  %v136_v36 = vld [vmem:[%s1957_s0 + $0x3b0] sm:$0xff] }
  0x4d   :  { %569 = vmatprep.mubr.f32.mxu1 %v1324_v10  ;;  %v159_v10 = vld [vmem:[%s1957_s0 + $0x468] sm:$0xff]  ;;  %v972_v44 = vpack.c.bf16 %v144_v37, %v136_v36  ;;  %v224_v36 = vld [vmem:[%s1957_s0 + $0x670] sm:$0xff] }
  0x4e   :  { %889 = vmatpush1.bf16.msra.mxu0 %v888_v39  ;;  %v153_v39 = vld [vmem:[%s1957_s0 + $0x438] sm:$0xff]  ;;  %v910_v41 = vpack.c.bf16 %v159_v10, %v151_v34  ;;  %v239_v34 = vld [vmem:[%s1957_s0 + $0x6e8] sm:$0xff] }
  0x4f   :  { %891 = vmatprep.subr.bf16.mxu0 %v890_v42  ;;  %953 = vmatpush1.bf16.msra.mxu1 %v952_v45  ;;  %v150_v42 = vld [vmem:[%s1957_s0 + $0x420] sm:$0xff]  ;;  %v167_v45 = vld [vmem:[%s1957_s0 + $0x4a8] sm:$0xff]  ;;  %v974_v47 = vpack.c.bf16 %v161_v40, %v153_v39  ;;  %v241_v39 = vld [vmem:[%s1957_s0 + $0x6f8] sm:$0xff] }
  0x50   :  { %955 = vmatprep.subr.bf16.mxu1 %v954_v48  ;;  %v152_v48 = vld [vmem:[%s1957_s0 + $0x430] sm:$0xff]  ;;  %v912_v50 = vpack.c.bf16 %v158_v43, %v150_v42  ;;  %v914_v53 = vpack.c.bf16 %v175_v46, %v167_v45  ;;  %v238_v42 = vld [vmem:[%s1957_s0 + $0x6e0] sm:$0xff]  ;;  %v255_v45 = vld [vmem:[%s1957_s0 + $0x768] sm:$0xff] }
  0x51   :  { %v976_v56 = vpack.c.bf16 %v160_v49, %v152_v48  ;;  %v240_v48 = vld [vmem:[%s1957_s0 + $0x6f0] sm:$0xff] }
  0x52   :  { %893 = vmatpush1.bf16.msra.mxu0 %v892_v51  ;;  %v169_v51 = vld [vmem:[%s1957_s0 + $0x4b8] sm:$0xff] }
  0x53   :  { %895 = vmatprep.subr.bf16.mxu0 %v894_v54  ;;  %957 = vmatpush1.bf16.msra.mxu1 %v956_v57  ;;  %v166_v54 = vld [vmem:[%s1957_s0 + $0x4a0] sm:$0xff]  ;;  %v183_v57 = vld [vmem:[%s1957_s0 + $0x528] sm:$0xff]  ;;  %v978_v59 = vpack.c.bf16 %v177_v52, %v169_v51  ;;  %v257_v51 = vld [vmem:[%s1957_s0 + $0x778] sm:$0xff] }
  0x54   :  { %959 = vmatprep.subr.bf16.mxu1 %v958_v60  ;;  %v168_v60 = vld [vmem:[%s1957_s0 + $0x4b0] sm:$0xff]  ;;  %v916_v62 = vpack.c.bf16 %v174_v55, %v166_v54  ;;  %v918_v1 = vpack.c.bf16 %v191_v58, %v183_v57  ;;  %v254_v54 = vld [vmem:[%s1957_s0 + $0x760] sm:$0xff]  ;;  %v271_v57 = vld [vmem:[%s1957_s0 + $0x7e8] sm:$0xff] }
  0x55   :  { %v980_v4 = vpack.c.bf16 %v176_v61, %v168_v60  ;;  %v256_v60 = vld [vmem:[%s1957_s0 + $0x770] sm:$0xff] }
  0x56   :  { %897 = vmatpush1.bf16.msra.mxu0 %v896_v63  ;;  %v185_v63 = vld [vmem:[%s1957_s0 + $0x538] sm:$0xff] }
  0x57   :  { %899 = vmatprep.subr.bf16.mxu0 %v898_v2  ;;  %961 = vmatpush1.bf16.msra.mxu1 %v960_v6  ;;  %v182_v2 = vld [vmem:[%s1957_s0 + $0x520] sm:$0xff]  ;;  %v207_v6 = vld [vmem:[%s1957_s0 + $0x5e8] sm:$0xff]  ;;  %v982_v7 = vpack.c.bf16 %v193_v0, %v185_v63  ;;  %v273_v63 = vld [vmem:[%s1957_s0 + $0x7f8] sm:$0xff] }
  0x58   :  { %963 = vmatprep.subr.bf16.mxu1 %v962_v11  ;;  %v184_v11 = vld [vmem:[%s1957_s0 + $0x530] sm:$0xff]  ;;  %v920_v13 = vpack.c.bf16 %v190_v3, %v182_v2  ;;  %v922_v17 = vpack.c.bf16 %v207_v6, %v199_v5  ;;  %v270_v2 = vld [vmem:[%s1957_s0 + $0x7e0] sm:$0xff] }
  0x59   :  { %v984_v20 = vpack.c.bf16 %v192_v12, %v184_v11  ;;  %v264_v5 = vld [vmem:[%s1957_s0 + $0x7b0] sm:$0xff] }
  0x5a   :  { %901 = vmatpush1.bf16.msra.mxu0 %v900_v15  ;;  %v201_v15 = vld [vmem:[%s1957_s0 + $0x5b8] sm:$0xff]  ;;  %v272_v6 = vld [vmem:[%s1957_s0 + $0x7f0] sm:$0xff] }
  0x5b   :  { %903 = vmatprep.subr.bf16.mxu0 %v902_v18  ;;  %965 = vmatpush1.bf16.msra.mxu1 %v964_v21  ;;  %v198_v18 = vld [vmem:[%s1957_s0 + $0x5a0] sm:$0xff]  ;;  %v215_v21 = vld [vmem:[%s1957_s0 + $0x628] sm:$0xff]  ;;  %v986_v23 = vpack.c.bf16 %v209_v16, %v201_v15  ;;  %v1004_v11 = vpack.c.bf16 %v272_v6, %v264_v5  ;;  %v1016_v5 = vmov 0  }
  0x5c   :  { %967 = vmatprep.subr.bf16.mxu1 %v966_v24  ;;  %v200_v24 = vld [vmem:[%s1957_s0 + $0x5b0] sm:$0xff]  ;;  %v924_v26 = vpack.c.bf16 %v206_v19, %v198_v18  ;;  %v926_v29 = vpack.c.bf16 %v223_v22, %v215_v21  ;;  %1009 = vset.pattern.permute.xlu1 %v1016_v5 }
  0x5d   :  { %v988_v32 = vpack.c.bf16 %v208_v25, %v200_v24 }
  0x5e   :  { %905 = vmatpush1.bf16.msra.mxu0 %v904_v27  ;;  %v217_v27 = vld [vmem:[%s1957_s0 + $0x638] sm:$0xff] }
  0x5f   :  { %907 = vmatprep.subr.bf16.mxu0 %v906_v30  ;;  %969 = vmatpush1.bf16.msra.mxu1 %v968_v33  ;;  %v214_v30 = vld [vmem:[%s1957_s0 + $0x620] sm:$0xff]  ;;  %v231_v33 = vld [vmem:[%s1957_s0 + $0x6a8] sm:$0xff]  ;;  %v990_v10 = vpack.c.bf16 %v225_v28, %v217_v27 }
  0x60   :  { %971 = vmatprep.subr.bf16.mxu1 %v970_v35  ;;  %v216_v35 = vld [vmem:[%s1957_s0 + $0x630] sm:$0xff]  ;;  %v928_v37 = vpack.c.bf16 %v222_v31, %v214_v30  ;;  %v930_v40 = vpack.c.bf16 %v239_v34, %v231_v33 }
  0x61   :  { %v992_v43 = vpack.c.bf16 %v224_v36, %v216_v35 }
  0x62   :  { %909 = vmatpush1.bf16.msra.mxu0 %v908_v38  ;;  %v233_v38 = vld [vmem:[%s1957_s0 + $0x6b8] sm:$0xff] }
  0x63   :  { %911 = vmatprep.subr.bf16.mxu0 %v910_v41  ;;  %973 = vmatpush1.bf16.msra.mxu1 %v972_v44  ;;  %v230_v41 = vld [vmem:[%s1957_s0 + $0x6a0] sm:$0xff]  ;;  %v247_v44 = vld [vmem:[%s1957_s0 + $0x728] sm:$0xff]  ;;  %v994_v46 = vpack.c.bf16 %v241_v39, %v233_v38 }
  0x64   :  { %975 = vmatprep.subr.bf16.mxu1 %v974_v47  ;;  %v232_v47 = vld [vmem:[%s1957_s0 + $0x6b0] sm:$0xff]  ;;  %v932_v49 = vpack.c.bf16 %v238_v42, %v230_v41  ;;  %v934_v52 = vpack.c.bf16 %v255_v45, %v247_v44 }
  0x65   :  { %v996_v55 = vpack.c.bf16 %v240_v48, %v232_v47 }
  0x66   :  { %913 = vmatpush1.bf16.msra.mxu0 %v912_v50  ;;  %v249_v50 = vld [vmem:[%s1957_s0 + $0x738] sm:$0xff] }
  0x67   :  { %915 = vmatprep.subr.bf16.mxu0 %v914_v53  ;;  %977 = vmatpush1.bf16.msra.mxu1 %v976_v56  ;;  %v246_v53 = vld [vmem:[%s1957_s0 + $0x720] sm:$0xff]  ;;  %v263_v56 = vld [vmem:[%s1957_s0 + $0x7a8] sm:$0xff]  ;;  %v998_v58 = vpack.c.bf16 %v257_v51, %v249_v50 }
  0x68   :  { %979 = vmatprep.subr.bf16.mxu1 %v978_v59  ;;  %v248_v59 = vld [vmem:[%s1957_s0 + $0x730] sm:$0xff]  ;;  %v936_v61 = vpack.c.bf16 %v254_v54, %v246_v53  ;;  %v938_v0 = vpack.c.bf16 %v271_v57, %v263_v56 }
  0x69   :  { %v1000_v3 = vpack.c.bf16 %v256_v60, %v248_v59 }
  0x6a   :  { %917 = vmatpush1.bf16.msra.mxu0 %v916_v62  ;;  %v265_v62 = vld [vmem:[%s1957_s0 + $0x7b8] sm:$0xff] }
  0x6b   :  { %919 = vmatprep.subr.bf16.mxu0 %v918_v1  ;;  %981 = vmatpush1.bf16.msra.mxu1 %v980_v4  ;;  %v262_v1 = vld [vmem:[%s1957_s0 + $0x7a0] sm:$0xff]  ;;  %v1002_v4 = vpack.c.bf16 %v273_v63, %v265_v62 }
  0x6c   :  { %983 = vmatprep.subr.bf16.mxu1 %v982_v7  ;;  %v940_v7 = vpack.c.bf16 %v270_v2, %v262_v1 }
  0x6e   :  { %921 = vmatpush1.bf16.msra.mxu0 %v920_v13 }
  0x6f   :  { %923 = vmatprep.subr.bf16.mxu0 %v922_v17  ;;  %985 = vmatpush1.bf16.msra.mxu1 %v984_v20 }
  0x70   :  { %987 = vmatprep.subr.bf16.mxu1 %v986_v23 }
  0x72   :  { %925 = vmatpush1.bf16.msra.mxu0 %v924_v26 }
  0x73   :  { %927 = vmatprep.subr.bf16.mxu0 %v926_v29  ;;  %989 = vmatpush1.bf16.msra.mxu1 %v988_v32 }
  0x74   :  { %991 = vmatprep.subr.bf16.mxu1 %v990_v10 }
  0x76   :  { %929 = vmatpush1.bf16.msra.mxu0 %v928_v37 }
  0x77   :  { %931 = vmatprep.subr.bf16.mxu0 %v930_v40  ;;  %993 = vmatpush1.bf16.msra.mxu1 %v992_v43 }
  0x78   :  { %995 = vmatprep.subr.bf16.mxu1 %v994_v46 }
  0x7a   :  { %933 = vmatpush1.bf16.msra.mxu0 %v932_v49 }
  0x7b   :  { %935 = vmatprep.subr.bf16.mxu0 %v934_v52  ;;  %997 = vmatpush1.bf16.msra.mxu1 %v996_v55 }
  0x7c   :  { %999 = vmatprep.subr.bf16.mxu1 %v998_v58 }
  0x7e   :  { %937 = vmatpush1.bf16.msra.mxu0 %v936_v61 }
  0x7f   :  { %939 = vmatprep.subr.bf16.mxu0 %v938_v0  ;;  %1001 = vmatpush1.bf16.msra.mxu1 %v1000_v3 }
  0x80   :  { %1003 = vmatprep.subr.bf16.mxu1 %v1002_v4 }
  0x82   :  { %941 = vmatpush1.bf16.msra.mxu0 %v940_v7 }
  0x83   :  { %1005 = vmatpush1.bf16.msra.mxu1 %v1004_v11 }
  0x85   :  { %493 = vmatmul.mubr.f32.vlgmr.msra.gmra.mrb[4].mxu0 %v1463_v14 }
  0x86   :  { %498 = vmatprep.mubr.f32.mxu0 %v1584_v8  ;;  %570 = vmatmul.mubr.f32.vlgmr.msra.gmra.mrb[4].mxu1 %v1463_v14 }
  0x87   :  { %575 = vmatprep.mubr.f32.mxu1 %v1584_v8 }
  0x89   :  { %499 = vmatmul.mubr.f32.gmra.mrb[6].mxu0 %v1589_v9 }
  0x8a   :  { %576 = vmatmul.mubr.f32.gmra.mrb[6].mxu1 %v1589_v9 }
 0x118   :  { %v1843_v12 = vpop.f32.mrb[0].mxu0 }
 0x119   :  { %v602_v13 = vmul.f32 %v1843_v12, %v1843_v12  ;;  %v1847_v15 = vpop.f32.mrb[1].mxu0  ;;  %v1853_v14 = vpop.f32.mrb[0].mxu1 }
 0x11a   :  { %v582_v16 = vadd.f32 %v1847_v15, %v1843_v12  ;;  %v603_v17 = vmul.f32 %v1847_v15, %v1847_v15  ;;  %v604_v8 = vmul.f32 %v1853_v14, %v1853_v14  ;;  %v1857_v18 = vpop.f32.mrb[1].mxu1 }
 0x11b   :  { %v605_v20 = vmul.f32 %v1857_v18, %v1857_v18 }
 0x11c   :  { %v618_v9 = vadd.f32 %v603_v17, %v602_v13  ;;  %v583_v19 = vadd.f32 %v582_v16, %v1853_v14  ;;  %v1863_v24 = vpop.f32.mrb[2].mxu0 }
 0x11d   :  { %v610_v25 = vmul.f32 %v1863_v24, %v1863_v24  ;;  %v1867_v26 = vpop.f32.mrb[3].mxu0 }
 0x11e   :  { %v619_v21 = vadd.f32 %v618_v9, %v604_v8  ;;  %v584_v22 = vadd.f32 %v583_v19, %v1857_v18  ;;  %v591_v27 = vadd.f32 %v1867_v26, %v1863_v24  ;;  %v611_v28 = vmul.f32 %v1867_v26, %v1867_v26 }
 0x11f   :  { %v1873_v29 = vpop.f32.mrb[2].mxu1 }
 0x120   :  { %v620_v23 = vadd.f32 %v619_v21, %v605_v20  ;;  %v612_v30 = vmul.f32 %v1873_v29, %v1873_v29  ;;  %v1877_v31 = vpop.f32.mrb[3].mxu1  ;;  %v627_v32 = vadd.f32 %v611_v28, %v610_v25  ;;  %v592_v33 = vadd.f32 %v591_v27, %v1873_v29  ;;  %v642_v28 = vld [vmem:[%s1959_s2] sm:$0xff] }
 0x121   :  { %v613_v34 = vmul.f32 %v1877_v31, %v1877_v31  ;;  %v1017_v27 = vmov 1  }
 0x122   :  { %v628_v10 = vadd.f32 %v627_v32, %v612_v30  ;;  %v593_v35 = vadd.f32 %v592_v33, %v1877_v31  ;;  %1010 = vset.pattern.permute.xlu0 %v1017_v27  ;;  %v643_v33 = vld [vmem:[%s1959_s2 + $0x8] sm:$0xff] }
 0x124   :  { %v629_v36 = vadd.f32 %v628_v10, %v613_v34 }
 0x158   :  { %v1883_v37 = vpop.f32.mrb[4].mxu0 }
 0x159   :  { %v585_v38 = vadd.f32 %v584_v22, %v1883_v37  ;;  %v606_v39 = vmul.f32 %v1883_v37, %v1883_v37  ;;  %v1888_v40 = vpop.f32.mrb[5].mxu0  ;;  %v1892_v42 = vpop.f32.mrb[4].mxu1 }
 0x15a   :  { %v607_v41 = vmul.f32 %v1888_v40, %v1888_v40  ;;  %v1895_v45 = vpop.f32.mrb[5].mxu1  ;;  %v608_v46 = vmul.f32 %v1892_v42, %v1892_v42 }
 0x15b   :  { %v621_v43 = vadd.f32 %v620_v23, %v606_v39  ;;  %v586_v44 = vadd.f32 %v585_v38, %v1888_v40  ;;  %v609_v60 = vmul.f32 %v1895_v45, %v1895_v45 }
 0x15c   :  { %v1899_v47 = vpop.f32.mrb[6].mxu0 }
 0x15d   :  { %v594_v48 = vadd.f32 %v593_v35, %v1899_v47  ;;  %v614_v49 = vmul.f32 %v1899_v47, %v1899_v47  ;;  %v1904_v50 = vpop.f32.mrb[7].mxu0  ;;  %v587_v51 = vadd.f32 %v586_v44, %v1892_v42  ;;  %v622_v52 = vadd.f32 %v621_v43, %v607_v41  ;;  %v1909_v54 = vpop.f32.mrb[6].mxu1 }
 0x15e   :  { %v615_v53 = vmul.f32 %v1904_v50, %v1904_v50  ;;  %v616_v57 = vmul.f32 %v1909_v54, %v1909_v54  ;;  %v1914_v58 = vpop.f32.mrb[7].mxu1 }
 0x15f   :  { %v630_v55 = vadd.f32 %v629_v36, %v614_v49  ;;  %v595_v56 = vadd.f32 %v594_v48, %v1904_v50  ;;  %v588_v59 = vadd.f32 %v587_v51, %v1895_v45  ;;  %v623_v61 = vadd.f32 %v622_v52, %v608_v46 }
 0x160   :  { %v617_v1 = vmul.f32 %v1914_v58, %v1914_v58 }
 0x161   :  { %v631_v62 = vadd.f32 %v630_v55, %v615_v53  ;;  %589 = vadd.xlane.f32.xlu0 %v588_v59  ;;  %v596_v63 = vadd.f32 %v595_v56, %v1909_v54  ;;  %v624_v0 = vadd.f32 %v623_v61, %v609_v60 }
 0x163   :  { %v597_v2 = vadd.f32 %v596_v63, %v1914_v58  ;;  %v632_v3 = vadd.f32 %v631_v62, %v616_v57  ;;  %625 = vadd.xlane.f32.xlu1 %v624_v0 }
 0x165   :  { %598 = vadd.xlane.f32.xlu0 %v597_v2  ;;  %v633_v4 = vadd.f32 %v632_v3, %v617_v1 }
 0x167   :  { %634 = vadd.xlane.f32.xlu1 %v633_v4 }
 0x1ee   :  { %v590_v6 = vpop.xlane.xlu0 %589 }
 0x1ef   :  { %v600_v7 = vmul.f32 0.0009765625, %v590_v6 }
 0x1f0   :  { %v626_v13 = vpop.xlane.xlu1 %625 }
 0x1f1   :  { %v638_v11 = vmul.f32 %v600_v7, %v600_v7  ;;  %v636_v16 = vmul.f32 0.0009765625, %v626_v13 }
 0x1f2   :  { %v599_v17 = vpop.xlane.xlu0 %598 }
 0x1f3   :  { %v601_v8 = vmul.f32 0.0009765625, %v599_v17  ;;  %v640_v9 = vsub.f32 %v636_v16, %v638_v11 }
 0x1f4   :  { %v635_v20 = vpop.xlane.xlu1 %634 }
 0x1f5   :  { %v639_v19 = vmul.f32 %v601_v8, %v601_v8  ;;  %v644_v21 = vadd.f32 1e-05, %v640_v9  ;;  %v637_v22 = vmul.f32 0.0009765625, %v635_v20 }
 0x1f7   :  { %1012 = vrsqrt.f32 %v644_v21  ;;  %v641_v23 = vsub.f32 %v637_v22, %v639_v19 }
 0x1f9   :  { %v645_v25 = vadd.f32 1e-05, %v641_v23 }
 0x1fb   :  { %1014 = vrsqrt.f32 %v645_v25 }
 0x201   :  { %v1013_v30 = vpop.eup %1012 }
 0x202   :  { %v648_v32 = vmul.f32 %v1013_v30, %v642_v28 }
 0x204   :  { %v650_v34 = vmul.f32 %v648_v32, %v600_v7 }
 0x205   :  { %v1015_v10 = vpop.eup %1014 }
 0x206   :  { %654 = vrot.lane.b32.xlu0 %v650_v34, %s1018_s16  ;;  %v649_v35 = vmul.f32 %v1015_v10, %v643_v33 }
 0x208   :  { %v651_v36 = vmul.f32 %v649_v35, %v601_v8 }
 0x20a   :  { %656 = vrot.lane.b32.xlu1 %v651_v36, %s1018_s16 }
 0x20e   :  { %664 = vperm.xlu1 %1009, %v648_v32  }
 0x212   :  { %669 = vperm.xlu1 %1009, %v649_v35  }
 0x216   :  { %1011 = vset.pattern.permute.xlu1 %v1017_v27 }
 0x278   :  { %v655_v38 = vpop.permute.xlu0 %654 }
 0x279   :  { %v660_v39 = vsub.f32 %v642_v28, %v655_v38 }
 0x27b   :  { %690 = vperm.xlu0 %1010, %v660_v39  }
 0x27c   :  { %v657_v41 = vpop.permute.xlu1 %656 }
 0x27d   :  { %v661_v43 = vsub.f32 %v643_v33, %v657_v41 }
 0x27f   :  { %695 = vperm.xlu1 %1011, %v661_v43  }
 0x28d   :  { %v665_v44 = vpop.permute.xlu1 %664 }
 0x28e   :  { %v672_v48 = vmul.f32 %v665_v44, %v1843_v12  ;;  %v673_v49 = vmul.f32 %v665_v44, %v1847_v15  ;;  %v674_v51 = vmul.f32 %v665_v44, %v1853_v14  ;;  %v675_v52 = vmul.f32 %v665_v44, %v1857_v18 }
 0x28f   :  { %v676_v53 = vmul.f32 %v665_v44, %v1883_v37  ;;  %v677_v55 = vmul.f32 %v665_v44, %v1888_v40  ;;  %v678_v56 = vmul.f32 %v665_v44, %v1892_v42  ;;  %v679_v57 = vmul.f32 %v665_v44, %v1895_v45 }
 0x291   :  { %v670_v46 = vpop.permute.xlu1 %669 }
 0x292   :  { %v680_v59 = vmul.f32 %v670_v46, %v1863_v24  ;;  %v681_v60 = vmul.f32 %v670_v46, %v1867_v26  ;;  %v682_v12 = vmul.f32 %v670_v46, %v1873_v29  ;;  %v683_v15 = vmul.f32 %v670_v46, %v1877_v31 }
 0x293   :  { %v684_v14 = vmul.f32 %v670_v46, %v1899_v47  ;;  %v685_v18 = vmul.f32 %v670_v46, %v1904_v50  ;;  %v686_v37 = vmul.f32 %v670_v46, %v1909_v54  ;;  %v687_v40 = vmul.f32 %v670_v46, %v1914_v58 }
 0x2fa   :  { %v691_v61 = vpop.permute.xlu0 %690 }
 0x2fb   :  { %v698_v42 = vadd.f32 %v691_v61, %v672_v48  ;;  %v699_v62 = vadd.f32 %v691_v61, %v673_v49  ;;  %v700_v45 = vadd.f32 %v691_v61, %v674_v51  ;;  %v701_v63 = vadd.f32 %v691_v61, %v675_v52 }
 0x2fc   :  { %v702_v24 = vadd.f32 %v691_v61, %v676_v53  ;;  %v703_v0 = vadd.f32 %v691_v61, %v677_v55  ;;  %v704_v26 = vadd.f32 %v691_v61, %v678_v56  ;;  %v705_v1 = vadd.f32 %v691_v61, %v679_v57 }
 0x2fd   :  { %v714_v29 = vmax.f32 %v698_v42, 0.0  ;;  %v715_v2 = vmax.f32 %v699_v62, 0.0  ;;  %v716_v31 = vmax.f32 %v700_v45, 0.0  ;;  %v717_v3 = vmax.f32 %v701_v63, 0.0 }
 0x2fe   :  { %v718_v4 = vmax.f32 %v702_v24, 0.0  ;;  %v719_v47 = vmax.f32 %v703_v0, 0.0  ;;  %v720_v5 = vmax.f32 %v704_v26, 0.0  ;;  %v721_v50 = vmax.f32 %v705_v1, 0.0  ;;  %v696_v6 = vpop.permute.xlu1 %695 }
 0x2ff   :  { %v730_v54 = vmax.f32 %v714_v29, %v716_v31  ;;  %v731_v7 = vmax.f32 %v715_v2, %v717_v3  ;;  %v706_v58 = vadd.f32 %v696_v6, %v680_v59  ;;  %v707_v11 = vadd.f32 %v696_v6, %v681_v60 }
 0x300   :  { %v734_v13 = vmax.f32 %v718_v4, %v720_v5  ;;  %v735_v16 = vmax.f32 %v719_v47, %v721_v50  ;;  %v708_v17 = vadd.f32 %v696_v6, %v682_v12  ;;  %v709_v8 = vadd.f32 %v696_v6, %v683_v15 }
 0x301   :  { %v710_v9 = vadd.f32 %v696_v6, %v684_v14  ;;  %v711_v19 = vadd.f32 %v696_v6, %v685_v18  ;;  %v712_v20 = vadd.f32 %v696_v6, %v686_v37  ;;  %v713_v21 = vadd.f32 %v696_v6, %v687_v40 }
 0x302   :  { %v738_v22 = vmax.f32 %v730_v54, %v734_v13  ;;  %v739_v23 = vmax.f32 %v731_v7, %v735_v16  ;;  %v722_v25 = vmax.f32 %v706_v58, 0.0  ;;  %v723_v27 = vmax.f32 %v707_v11, 0.0 }
 0x303   :  { %v724_v28 = vmax.f32 %v708_v17, 0.0  ;;  %v725_v30 = vmax.f32 %v709_v8, 0.0  ;;  %v726_v32 = vmax.f32 %v710_v9, 0.0  ;;  %v727_v33 = vmax.f32 %v711_v19, 0.0 }
 0x304   :  { %742 = vst [vmem:[%s1960_s3] sm:$0xff] %v738_v22  ;;  %743 = vst [vmem:[%s1960_s3 + $0x8] sm:$0xff] %v739_v23  ;;  %v728_v34 = vmax.f32 %v712_v20, 0.0  ;;  %v729_v10 = vmax.f32 %v713_v21, 0.0 }
 0x305   :  { %v732_v35 = vmax.f32 %v722_v25, %v724_v28  ;;  %v733_v36 = vmax.f32 %v723_v27, %v725_v30 }
 0x306   :  { %v736_v38 = vmax.f32 %v726_v32, %v728_v34  ;;  %v737_v39 = vmax.f32 %v727_v33, %v729_v10 }
 0x308   :  { %v740_v41 = vmax.f32 %v732_v35, %v736_v38  ;;  %v741_v43 = vmax.f32 %v733_v36, %v737_v39 }
 0x30a   :  { %744 = vst [vmem:[%s1960_s3 + $0x10] sm:$0xff] %v740_v41  ;;  %745 = vst [vmem:[%s1960_s3 + $0x18] sm:$0xff] %v741_v43 }

</bundles_post_ra>
